<compile_context>
chip_gen: v7x
topology: tpu7x:2x2x1
jax: 0.10.0
libtpu: 0.0.40
codegen_flags: <defaults>
</compile_context>

<pallas_src>
import functools

import jax
import jax.numpy as jnp
from jax.experimental import pallas as pl
from jax.experimental.pallas import tpu as pltpu

FOCAL_LOSS_ALPHA = 0.25   # config.FOCAL_LOSS_ALPHA
FOCAL_LOSS_GAMMA = 2.0    # config.FOCAL_LOSS_GAMMA

_LANES = 128
# 4096 rows * 128 lanes * 4 B = 2 MiB per f32 input buffer; 2 inputs,
# double-buffered -> 8 MiB.  Safe on v5e/v6e (16/32 MiB scoped default) and
# v7x (32 MiB scoped / 64 MiB physical).  Already past the ~512-row roofline
# plateau, so no reason to go bigger.
_MAX_BLOCK_ROWS = 4096
# Below this, a fused XLA elementwise+reduce beats launch + packing overhead.
_MIN_PALLAS_ELEMS = 1 << 15


def _focal_loss_elementwise(x, t, alpha, gamma):
    x = x.astype(jnp.float32)
    t = t.astype(jnp.float32)
    bce = jnp.maximum(x, 0.0) - x * t + jnp.log1p(jnp.exp(-jnp.abs(x)))
    pt = jnp.exp(-bce)
    return alpha * (1.0 - pt) ** gamma * bce


def focal_loss_ref(logits, targets, alpha=FOCAL_LOSS_ALPHA,
                   gamma=FOCAL_LOSS_GAMMA, reduction="mean"):
    """Pure-JAX reference (also the small-input / reduction='none' path)."""
    fl = _focal_loss_elementwise(logits, targets, alpha, gamma)
    if reduction == "mean":
        return jnp.mean(fl)
    if reduction == "sum":
        return jnp.sum(fl)
    return fl


def _focal_loss_kernel(x_ref, t_ref, out_ref, *, alpha, gamma,
                       total_elems, block_rows, needs_mask):
    # Cast in-kernel (inputs may be bf16; cast is cheap VALU work and halves
    # HBM traffic vs. upcasting in the wrapper).
    x = x_ref[...].astype(jnp.float32)
    t = t_ref[...].astype(jnp.float32)

    # BCE-with-logits, elementwise, numerically stable (matches PyTorch).
    bce = jnp.maximum(x, 0.0) - x * t + jnp.log1p(jnp.exp(-jnp.abs(x)))
    pt = jnp.exp(-bce)
    omp = 1.0 - pt

    # (1 - pt) ** gamma without hitting the EUP for integer gamma.
    if gamma == 2.0:
        mod = omp * omp
    elif float(gamma).is_integer() and gamma >= 0:
        mod = jnp.ones_like(omp)
        for _ in range(int(gamma)):
            mod = mod * omp
    else:
        mod = jnp.power(omp, gamma)

    fl = alpha * mod * bce

    def _partial(v):
        # (block_rows, 128) -> (block_rows//8, 8, 128) regroups whole native
        # (8,128) tiles (no data movement); the axis-0 sum is a VALU vreg-add
        # tree.  One (8,128) vreg leaves the step -> single unmasked vst.
        return jnp.sum(v.reshape(block_rows // 8, 8, _LANES), axis=0)

    if needs_mask:
        step = pl.program_id(0)
        last = pl.num_programs(0) - 1

        @pl.when(step != last)
        def _():
            out_ref[...] = _partial(fl)

        @pl.when(step == last)
        def _():
            # Mask zero-padded and out-of-bounds tail elements exactly
            # (global flat index >= total_elems).  Select (not multiply) so
            # inf/NaN from garbage tail values can never leak into the sum.
            row_ids = jax.lax.broadcasted_iota(jnp.int32, fl.shape, 0)
            lane_ids = jax.lax.broadcasted_iota(jnp.int32, fl.shape, 1)
            flat_idx = (step * block_rows + row_ids) * _LANES + lane_ids
            out_ref[...] = _partial(jnp.where(flat_idx < total_elems, fl, 0.0))
    else:
        out_ref[...] = _partial(fl)


def focal_loss(logits, targets, alpha=FOCAL_LOSS_ALPHA,
               gamma=FOCAL_LOSS_GAMMA, reduction="mean",
               max_block_rows=_MAX_BLOCK_ROWS,
               min_pallas_elems=_MIN_PALLAS_ELEMS):
    """Focal loss.  logits/targets: any matching shape, any float dtype."""
    assert logits.shape == targets.shape
    total = int(logits.size)

    # 'none' is pure elementwise (no reduction to fuse) and tiny inputs are
    # pure launch overhead -> fused XLA path.
    if reduction not in ("mean", "sum") or total == 0 or total < min_pallas_elems:
        return focal_loss_ref(logits, targets, alpha, gamma, reduction)

    # Lane-dense packing: flatten to (rows, 128).
    rows = -(-total // _LANES)                              # cdiv
    block_rows = max(8, (int(max_block_rows) // 8) * 8)
    block_rows = min(block_rows, ((rows + 7) // 8) * 8)
    grid = -(-rows // block_rows)                           # ragged last block OK

    x = logits.reshape(-1)
    t = targets.reshape(-1)
    if total % _LANES != 0:
        # Only the non-lane-aligned case pays a pad copy (< 128 extra elems).
        pad = rows * _LANES - total
        x = jnp.pad(x, (0, pad))
        t = jnp.pad(t, (0, pad))
    x = x.reshape(rows, _LANES)
    t = t.reshape(rows, _LANES)

    # True if the grid's coverage exceeds the real elements (zero-padded tail
    # and/or out-of-bounds rows in the ragged last block).
    needs_mask = total != grid * block_rows * _LANES

    kernel = functools.partial(
        _focal_loss_kernel,
        alpha=float(alpha), gamma=float(gamma),
        total_elems=total, block_rows=block_rows, needs_mask=needs_mask)

    partials = pl.pallas_call(
        kernel,
        out_shape=jax.ShapeDtypeStruct((grid * 8, _LANES), jnp.float32),
        grid_spec=pltpu.PrefetchScalarGridSpec(
            num_scalar_prefetch=0,
            grid=(grid,),
            in_specs=[
                pl.BlockSpec((block_rows, _LANES), lambda i: (i, 0)),
                pl.BlockSpec((block_rows, _LANES), lambda i: (i, 0)),
            ],
            # Each grid step owns its own (8,128) partial-sum block -> the axis
            # is truly parallel (v7x megacore splits it across the 2 TCs).
            out_specs=pl.BlockSpec((8, _LANES), lambda i: (i, 0)),
        ),
        compiler_params=pltpu.CompilerParams(
            dimension_semantics=("parallel",)),
    )(x, t)

    total_sum = jnp.sum(partials)        # tiny fused XLA reduce over grid*8*128 f32
    if reduction == "mean":
        return total_sum * jnp.float32(1.0 / total)
    return total_sum


if __name__ == "__main__":
    key = jax.random.PRNGKey(0)
    ks = jax.random.split(key, 8)

    # 1) Shipped shape (batch, NUM_LABELS=9) -- small-input fused-XLA fallback.
    B, C = 64, 9
    logits = jax.random.normal(ks[0], (B, C), dtype=jnp.float32)
    targets = (jax.random.uniform(ks[1], (B, C)) > 0.5).astype(jnp.float32)
    ref = focal_loss_ref(logits, targets)
    out = jax.block_until_ready(focal_loss(logits, targets))
    assert jnp.allclose(out, ref, rtol=1e-5, atol=1e-6), (out, ref)

    # 2) Same small shape forced through the Pallas kernel
    #    (pad path, single grid step, masked ragged tail).
    out = jax.block_until_ready(focal_loss(logits, targets, min_pallas_elems=0))
    assert jnp.allclose(out, ref, rtol=1e-5, atol=1e-6), (out, ref)

    # 3) Lane-aligned bf16 inputs (total % 128 == 0 -> no pad copy), several
    #    grid steps with a ragged, OOB-masked last block.
    B2, C2 = 200, 128
    logits2 = jax.random.normal(ks[2], (B2, C2), dtype=jnp.bfloat16)
    targets2 = (jax.random.uniform(ks[3], (B2, C2)) > 0.5).astype(jnp.bfloat16)
    ref2 = focal_loss_ref(logits2, targets2)
    out2 = jax.block_until_ready(
        focal_loss(logits2, targets2, max_block_rows=64, min_pallas_elems=0))
    assert jnp.allclose(out2, ref2, rtol=1e-4, atol=1e-5), (out2, ref2)

    # 4) Exact-fit case (no mask branch generated), multi-step parallel grid.
    B3, C3 = 512, 128
    logits3 = jax.random.normal(ks[4], (B3, C3), dtype=jnp.float32)
    targets3 = (jax.random.uniform(ks[5], (B3, C3)) > 0.5).astype(jnp.float32)
    ref3 = focal_loss_ref(logits3, targets3)
    out3 = jax.block_until_ready(
        focal_loss(logits3, targets3, max_block_rows=64, min_pallas_elems=0))
    assert jnp.allclose(out3, ref3, rtol=1e-5, atol=1e-6), (out3, ref3)

    # 5) Ragged batch, non-aligned (37, 9) forced through the kernel.
    B4, C4 = 37, 9
    logits4 = jax.random.normal(ks[6], (B4, C4), dtype=jnp.float32)
    targets4 = (jax.random.uniform(ks[7], (B4, C4)) > 0.5).astype(jnp.float32)
    ref4 = focal_loss_ref(logits4, targets4)
    out4 = jax.block_until_ready(focal_loss(logits4, targets4, min_pallas_elems=0))
    assert jnp.allclose(out4, ref4, rtol=1e-5, atol=1e-6), (out4, ref4)

    print("KERNEL_OK")
</pallas_src>

<mosaic_0001>
module attributes {stable_mosaic.version = 11 : i64} {
  func.func @_focal_loss_kernel(%arg0: i32, %arg1: memref<8x128xf32, #tpu.memory_space<vmem>>, %arg2: memref<8x128xf32, #tpu.memory_space<vmem>>, %arg3: memref<8x128xf32, #tpu.memory_space<vmem>>) attributes {dimension_semantics = [#tpu.dimension_semantics<parallel>], iteration_bounds = array<i64: 1>, scalar_prefetch = 0 : i64, scratch_operands = 0 : i64, tpu.core_type = #tpu.core_type<tc>, window_params = [{transform_indices = @transform_0, window_bounds = array<i64: 8, 128>}, {transform_indices = @transform_1, window_bounds = array<i64: 8, 128>}, {transform_indices = @transform_2, window_bounds = array<i64: 8, 128>}]} {
    %c0 = arith.constant 0 : index
    %c0_0 = arith.constant 0 : index
    %0 = vector.load %arg1[%c0, %c0_0] : memref<8x128xf32, #tpu.memory_space<vmem>>, vector<8x128xf32>
    %c0_1 = arith.constant 0 : index
    %c0_2 = arith.constant 0 : index
    %1 = vector.load %arg2[%c0_1, %c0_2] : memref<8x128xf32, #tpu.memory_space<vmem>>, vector<8x128xf32>
    %cst = arith.constant 0.000000e+00 : f32
    %2 = vector.broadcast %cst : f32 to vector<8x128xf32>
    %3 = arith.maximumf %0, %2 : vector<8x128xf32>
    %4 = arith.mulf %0, %1 : vector<8x128xf32>
    %5 = arith.subf %3, %4 : vector<8x128xf32>
    %6 = math.absf %0 : vector<8x128xf32>
    %cst_3 = arith.constant 0.000000e+00 : f32
    %7 = vector.broadcast %cst_3 : f32 to vector<8x128xf32>
    %8 = arith.subf %7, %6 : vector<8x128xf32>
    %9 = math.exp %8 : vector<8x128xf32>
    %10 = math.log1p %9 : vector<8x128xf32>
    %11 = arith.addf %5, %10 : vector<8x128xf32>
    %cst_4 = arith.constant 0.000000e+00 : f32
    %12 = vector.broadcast %cst_4 : f32 to vector<8x128xf32>
    %13 = arith.subf %12, %11 : vector<8x128xf32>
    %14 = math.exp %13 : vector<8x128xf32>
    %cst_5 = arith.constant 1.000000e+00 : f32
    %15 = vector.broadcast %cst_5 : f32 to vector<8x128xf32>
    %16 = arith.subf %15, %14 : vector<8x128xf32>
    %17 = arith.mulf %16, %16 : vector<8x128xf32>
    %cst_6 = arith.constant 2.500000e-01 : f32
    %18 = vector.broadcast %cst_6 : f32 to vector<8x128xf32>
    %19 = arith.mulf %18, %17 : vector<8x128xf32>
    %20 = arith.mulf %19, %11 : vector<8x128xf32>
    %c0_i32 = arith.constant 0 : i32
    %21 = arith.cmpi ne, %arg0, %c0_i32 : i32
    %22 = arith.extui %21 : i1 to i32
    %c0_i32_7 = arith.constant 0 : i32
    %23 = arith.cmpi ne, %22, %c0_i32_7 : i32
    scf.if %23 {
      %27 = vector.shape_cast %20 : vector<8x128xf32> to vector<1x8x128xf32>
      %cst_10 = arith.constant dense<0.000000e+00> : vector<8x128xf32>
      %28 = vector.multi_reduction <add>, %27, %cst_10 [0] : vector<1x8x128xf32> to vector<8x128xf32>
      %c0_11 = arith.constant 0 : index
      %c0_12 = arith.constant 0 : index
      %29 = vector.load %arg3[%c0_11, %c0_12] : memref<8x128xf32, #tpu.memory_space<vmem>>, vector<8x128xf32>
      tpu.vector_store %arg3[%c0_11, %c0_12], %28 {strides = array<i32>} : memref<8x128xf32, #tpu.memory_space<vmem>>, vector<8x128xf32>,
    } else {
    }
    %c0_i32_8 = arith.constant 0 : i32
    %24 = arith.cmpi eq, %arg0, %c0_i32_8 : i32
    %25 = arith.extui %24 : i1 to i32
    %c0_i32_9 = arith.constant 0 : i32
    %26 = arith.cmpi ne, %25, %c0_i32_9 : i32
    scf.if %26 {
      %27 = tpu.iota {dimensions = array<i32: 0>} : vector<8x128xi32>
      %28 = tpu.iota {dimensions = array<i32: 1>} : vector<8x128xi32>
      %c8_i32 = arith.constant 8 : i32
      %29 = arith.muli %arg0, %c8_i32 : i32
      %30 = vector.broadcast %29 : i32 to vector<8x128xi32>
      %31 = arith.addi %30, %27 : vector<8x128xi32>
      %c128_i32 = arith.constant 128 : i32
      %32 = vector.broadcast %c128_i32 : i32 to vector<8x128xi32>
      %33 = arith.muli %31, %32 : vector<8x128xi32>
      %34 = arith.addi %33, %28 : vector<8x128xi32>
      %c576_i32 = arith.constant 576 : i32
      %35 = vector.broadcast %c576_i32 : i32 to vector<8x128xi32>
      %36 = arith.cmpi slt, %34, %35 : vector<8x128xi32>
      %cst_10 = arith.constant 0.000000e+00 : f32
      %37 = vector.broadcast %cst_10 : f32 to vector<8x128xf32>
      %38 = arith.select %36, %20, %37 : vector<8x128xi1>, vector<8x128xf32>
      %39 = vector.shape_cast %38 : vector<8x128xf32> to vector<1x8x128xf32>
      %cst_11 = arith.constant dense<0.000000e+00> : vector<8x128xf32>
      %40 = vector.multi_reduction <add>, %39, %cst_11 [0] : vector<1x8x128xf32> to vector<8x128xf32>
      %c0_12 = arith.constant 0 : index
      %c0_13 = arith.constant 0 : index
      %41 = vector.load %arg3[%c0_12, %c0_13] : memref<8x128xf32, #tpu.memory_space<vmem>>, vector<8x128xf32>
      tpu.vector_store %arg3[%c0_12, %c0_13], %40 {strides = array<i32>} : memref<8x128xf32, #tpu.memory_space<vmem>>, vector<8x128xf32>,
    } else {
    }
    return
  }
  func.func @transform_0(%arg0: i32) -> (i32, i32) {
    %c0_i32 = arith.constant 0 : i32
    %c0_i32_0 = arith.constant 0 : i32
    return %arg0, %c0_i32 : i32, i32
  }
  func.func @transform_1(%arg0: i32) -> (i32, i32) {
    %c0_i32 = arith.constant 0 : i32
    %c0_i32_0 = arith.constant 0 : i32
    return %arg0, %c0_i32 : i32, i32
  }
  func.func @transform_2(%arg0: i32) -> (i32, i32) {
    %c0_i32 = arith.constant 0 : i32
    %c0_i32_0 = arith.constant 0 : i32
    return %arg0, %c0_i32 : i32, i32
  }
}

</mosaic_0001>

<bundles_post_ra>
// kernel: tpu_custom_call.1
= control target key start
LH: loop header
LB: loop body
LE: loop exit
PB: predicated region body
PF: predicated region fallthrough
CT: control target
= control target key end

     0   :  { %7 = vsyncpa [#allocation3], 0  ;;  %s236_s0 = inlined_call_operand.hbm [shape: f32[5,128], index: 0, kind: input, shape index: {}]   ;;  %s237_s1 = inlined_call_operand.hbm [shape: f32[5,128], index: 1, kind: input, shape index: {}]   ;;  %s238_s2 = inlined_call_operand.hbm [shape: f32[8,128], index: 2, kind: output, shape index: {}]  }
   0x1   :  { %8 = vsyncpa [#allocation6], 0 }
   0x2   :  { %9 = vsyncpa [#allocation4], 0  ;;  %s182_s9 = smov [#allocation2]   ;;  %s183_s11 = smov [#allocation5]  }
   0x3   :  { %s16_s10 = sshll.u32 %s182_s9, 4  ;;  %s26_s12 = sshll.u32 %s183_s11, 4  ;;  %s17_s10 = int_to_ptr.vmem [resolvable:$true] %s16_s10  ;;  %s27_s12 = int_to_ptr.vmem [resolvable:$true] %s26_s12 }
   0x4   :  { %s110_s15 = scalar_lea.hbm %s236_s0, 128 }
   0x5   :  { %p111_p0 = scmp.ne.s32.totalorder %s236_s0, %s110_s15  ;;  %p114_p1 = scmp.lt.u32.totalorder %s110_s15, %s236_s0 }
   0x7   :  { %p116_p2 = pnand %p114_p1, %p111_p0 }
   0x9   :  { %119 = shalt.err (!%p116_p2)
}
   0xa   :  { %s120_s20 = scalar_lea.vmem %s17_s10, 128  ;;  %p125_p4 = scmp.lt.s32.totalorder %s17_s10, %s17_s10 }
   0xb   :  { %p121_p3 = scmp.ne.s32.totalorder %s17_s10, %s120_s20  ;;  %p126_p5 = scmp.lt.s32.totalorder %s120_s20, %s120_s20 }
   0xd   :  { %p127_p6 = por %p126_p5, %p125_p4 }
   0xf   :  { %p128_p7 = pnand %p127_p6, %p121_p3 }
  0x11   :  { %131 = shalt.err (!%p128_p7)
}
  0x12   :  { %19 = dma.hbm_to_vmem [thread:$0]  %s236_s0, 128, %s17_s10, [#allocation3]  }
  0x13   :  { %s132_s25 = scalar_lea.hbm %s237_s1, 128 }
  0x14   :  { %p133_p8 = scmp.ne.s32.totalorder %s237_s1, %s132_s25  ;;  %p136_p9 = scmp.lt.u32.totalorder %s132_s25, %s237_s1 }
  0x16   :  { %p138_p10 = pnand %p136_p9, %p133_p8 }
  0x18   :  { %141 = shalt.err (!%p138_p10)
}
  0x19   :  { %s142_s30 = scalar_lea.vmem %s27_s12, 128  ;;  %p147_p12 = scmp.lt.s32.totalorder %s27_s12, %s27_s12 }
  0x1a   :  { %p143_p11 = scmp.ne.s32.totalorder %s27_s12, %s142_s30  ;;  %p148_p13 = scmp.lt.s32.totalorder %s142_s30, %s142_s30 }
  0x1c   :  { %p149_p0 = por %p148_p13, %p147_p12 }
  0x1e   :  { %p150_p1 = pnand %p149_p0, %p143_p11 }
  0x20   :  { %153 = shalt.err (!%p150_p1)
}
  0x21   :  { %29 = dma.hbm_to_vmem [thread:$0]  %s237_s1, 128, %s27_s12, [#allocation6]  }
  0x22   :  { %176 = dma.done.wait [#allocation3], 128  }
  0x23   :  { %177 = vsyncadd [#allocation3], 4294967168 }
  0x24   :  { %178 = dma.done.wait [#allocation6], 128  }
  0x25   :  { %179 = vsyncadd [#allocation6], 4294967168  ;;  %v36_v0 = vld [vmem:[#allocation2] sm:$0xff]  ;;  %v37_v7 = vld [vmem:[#allocation5] sm:$0xff]  ;;  %v72_v20 = vlaneseq  ;;  %s184_s1 = smov [#allocation7]  }
  0x26   :  { %v41_v1 = vand.u32 2147483647, %v36_v0  ;;  %v38_v9 = vmax.f32 %v36_v0, 0.0  ;;  %v39_v10 = vmul.f32 %v37_v7, %v36_v0  ;;  %s91_s4 = sshll.u32 %s184_s1, 4  ;;  %s92_s4 = int_to_ptr.vmem [resolvable:$true] %s91_s4 }
  0x27   :  { %v73_v21 = vshrl.u32 %v72_v20, 7  ;;  %v75_v22 = vand.u32 127, %v72_v20  ;;  %s154_s5 = scalar_lea.vmem %s92_s4, 128  ;;  %p159_p3 = scmp.lt.s32.totalorder %s92_s4, %s92_s4 }
  0x28   :  { %v42_v2 = vsub.f32 0.0, %v41_v1  ;;  %v40_v14 = vsub.f32 %v38_v9, %v39_v10  ;;  %p155_p2 = scmp.ne.s32.totalorder %s92_s4, %s154_s5  ;;  %p160_p4 = scmp.lt.s32.totalorder %s154_s5, %s154_s5 }
  0x29   :  { %v79_v23 = vmul.u32 128, %v73_v21 }
  0x2a   :  { %v43_v3 = vmul.f32 1.442695, %v42_v2  ;;  %p161_p5 = por %p160_p4, %p159_p3 }
  0x2b   :  { %v80_v26 = vadd.s32 %v79_v23, %v75_v22 }
  0x2c   :  { %104 = vpow2.f32 %v43_v3  ;;  %p162_p6 = pnand %p161_p5, %p155_p2 }
  0x2d   :  { %vm81_vm1 = vcmp.lt.s32.totalorder %v80_v26, 576 }
  0x36   :  { %v105_v4 = vpop.eup %104 }
  0x37   :  { %v45_v5 = vadd.f32 1.0, %v105_v4  ;;  %v48_v6 = vmul.f32 -0.5, %v105_v4  ;;  %v51_v11 = vand.u32 2147483647, %v105_v4 }
  0x39   :  { %106 = vlog2.f32 %v45_v5  ;;  %v49_v8 = vadd.f32 1.0, %v48_v6  ;;  %vm52_vm0 = vcmp.lt.f32.partialorder %v51_v11, 0.0004427343 }
  0x3b   :  { %v50_v12 = vmul.f32 %v105_v4, %v49_v8 }
  0x43   :  { %v107_v13 = vpop.eup %106 }
  0x44   :  { %v47_v15 = vmul.f32 0.6931472, %v107_v13 }
  0x46   :  { %v53_v16 = vsel %vm52_vm0, %v50_v12, %v47_v15 }
  0x47   :  { %v54_v17 = vadd.f32 %v53_v16, %v40_v14 }
  0x49   :  { %v55_v18 = vsub.f32 0.0, %v54_v17 }
  0x4b   :  { %v56_v19 = vmul.f32 1.442695, %v55_v18 }
  0x4d   :  { %108 = vpow2.f32 %v56_v19 }
  0x57   :  { %v109_v24 = vpop.eup %108 }
  0x58   :  { %v58_v25 = vsub.f32 1.0, %v109_v24 }
  0x5a   :  { %v59_v27 = vmul.f32 %v58_v25, %v58_v25 }
  0x5c   :  { %v60_v28 = vmul.f32 0.25, %v59_v27 }
  0x5e   :  { %v61_v29 = vmul.f32 %v60_v28, %v54_v17 }
  0x60   :  { %v82_v30 = vsel %vm81_vm1, %v61_v29, 0.0 }
  0x61   :  { %84 = vst [vmem:[#allocation7] sm:$0xff] %v82_v30 }
  0x62   :  { %165 = shalt.err (!%p162_p6)
}
  0x63   :  { %s166_s8 = scalar_lea.hbm %s238_s2, 128 }
  0x64   :  { %p167_p7 = scmp.ne.s32.totalorder %s238_s2, %s166_s8  ;;  %p170_p8 = scmp.lt.u32.totalorder %s166_s8, %s238_s2 }
  0x66   :  { %p172_p9 = pnand %p170_p8, %p167_p7 }
  0x68   :  { %175 = shalt.err (!%p172_p9)
}
  0x69   :  { %94 = dma.vmem_to_hbm [thread:$0]  %s92_s4, 128, %s238_s2, [#allocation4]  }
  0x6a   :  { %180 = dma.done.wait [#allocation4], 128  }
  0x6b   :  { %181 = vsyncadd [#allocation4], 4294967168 }
  0x6c   :  { %98 = vsyncpa [#allocation3], 1 }
  0x6d   :  { %99 = vsyncpa [#allocation6], 1 }
  0x6e   :  { %100 = vsyncpa [#allocation4], 1 }

</bundles_post_ra>
